<compile_context>
chip_gen: v6e
topology: v6e:2x2x1
jax: 0.10.0
libtpu: 0.0.40
codegen_flags: <defaults>
</compile_context>

<pallas_src>
import functools

import jax
import jax.numpy as jnp
from jax.experimental import pallas as pl
from jax.experimental.pallas import tpu as pltpu

_LANE = 128


def _round_up(x: int, m: int) -> int:
    return ((x + m - 1) // m) * m


# --------------------------------------------------------------------------
# Kernels
# --------------------------------------------------------------------------
def _mlp_kernel_lane(x_ref, w1_ref, b1_ref, w2_ref, b2_ref, o_ref):
    """Specialized n_features==1, n_output==1 path.

    x_ref/o_ref: (rows, 128) f32 VMEM -- batch samples on the lane axis.
    w1/b1/w2:    (H,) f32 SMEM scalars; b2: (1,) f32 SMEM scalar.
    All compute is VPU; H is small and statically unrolled.
    """
    x = x_ref[...]                                   # (rows, 128)
    n_hidden = w1_ref.shape[0]
    acc = jnp.zeros_like(x)
    for hh in range(n_hidden):                       # static unroll
        acc = acc + w2_ref[hh] * jnp.maximum(w1_ref[hh] * x + b1_ref[hh], 0.0)
    o_ref[...] = (acc + b2_ref[0]).astype(o_ref.dtype)


def _mlp_kernel_mxu(x_ref, w1_ref, b1_ref, w2_ref, b2_ref, o_ref):
    """General path.  Hidden dim is zero-padded to Hp (lane aligned); the
    output is emitted at its logical width (no Op padding, no post-slice)."""
    x = x_ref[...]
    w1 = w1_ref[...]
    if x.shape[-1] == 1:
        # n_features == 1: layer 1 is an outer product -> VPU broadcast mul.
        h = x * w1                                               # (bn,1)*(1,Hp)
    else:
        h = jnp.dot(x, w1, preferred_element_type=jnp.float32)   # MXU
    h = jnp.maximum(h + b1_ref[...], 0.0)                        # bias + ReLU

    w2 = w2_ref[...]
    if o_ref.shape[-1] == 1 and w2.shape[0] == 1:
        # n_output == 1: w2 is stored as a (1, Hp) row -> VPU mul + lane reduce
        # (XLU) instead of an MXU dot with 127 all-zero output columns.
        y = jnp.sum(h * w2, axis=-1, keepdims=True)
    else:
        y = jnp.dot(h, w2, preferred_element_type=jnp.float32)   # MXU
    o_ref[...] = (y + b2_ref[...]).astype(o_ref.dtype)


# --------------------------------------------------------------------------
# Parameter preparation (runs ONCE, outside the per-call path)
# --------------------------------------------------------------------------
def prepare_params(w1, b1, w2, b2):
    """Pre-process parameters once at init.

    Returns (mode, params):
      mode == "lane": n_features==1 and n_output==1 -> flat SMEM scalars.
      mode == "mxu" : hidden dim zero-padded to a lane multiple; for
                      n_output==1 w2 is stored as a (1, Hp) row.
    Zero padding is mathematically inert through Linear + ReLU.
    """
    F, H = w1.shape
    O = w2.shape[1]
    w1 = jnp.asarray(w1, jnp.float32)
    b1 = jnp.asarray(b1, jnp.float32)
    w2 = jnp.asarray(w2, jnp.float32)
    b2 = jnp.asarray(b2, jnp.float32)

    if F == 1 and O == 1:
        return "lane", (w1.reshape(H), b1.reshape(H),
                        w2.reshape(H), b2.reshape(1))

    Hp = _round_up(H, _LANE)
    w1p = jnp.zeros((F, Hp), jnp.float32).at[:, :H].set(w1)
    b1p = jnp.zeros((1, Hp), jnp.float32).at[0, :H].set(b1)
    if O == 1:
        w2p = jnp.zeros((1, Hp), jnp.float32).at[0, :H].set(w2[:, 0])
    else:
        w2p = jnp.zeros((Hp, O), jnp.float32).at[:H, :].set(w2)
    b2p = b2.reshape(1, O)
    return "mxu", (w1p, b1p, w2p, b2p)


# --------------------------------------------------------------------------
# Forward wrappers
# --------------------------------------------------------------------------
@functools.partial(jax.jit, static_argnames=("block_rows",))
def _forward_lane(x, w1, b1, w2, b2, *, block_rows=64):
    """n_features==1, n_output==1: batch on the lane axis, lane-dense I/O."""
    N = x.shape[0]
    rows = (N + _LANE - 1) // _LANE
    Np = rows * _LANE
    xf = jnp.pad(x.reshape(N), (0, Np - N))
    x_lane = xf.reshape(rows, _LANE)

    smem = pl.BlockSpec(memory_space=pltpu.MemorySpace.SMEM)

    if rows > block_rows:
        # Batch-parallel grid (cdiv: ragged last tile is masked by Pallas).
        out_lane = pl.pallas_call(
            _mlp_kernel_lane,
            out_shape=jax.ShapeDtypeStruct((rows, _LANE), jnp.float32),
            grid=(pl.cdiv(rows, block_rows),),
            in_specs=[
                pl.BlockSpec((block_rows, _LANE), lambda i: (i, 0)),
                smem, smem, smem, smem,
            ],
            out_specs=pl.BlockSpec((block_rows, _LANE), lambda i: (i, 0)),
            compiler_params=pltpu.CompilerParams(
                dimension_semantics=("parallel",)),
        )(x_lane, w1, b1, w2, b2)
    else:
        # Gridless single block; block shape == full array dims.
        out_lane = pl.pallas_call(
            _mlp_kernel_lane,
            out_shape=jax.ShapeDtypeStruct((rows, _LANE), jnp.float32),
            in_specs=[
                pl.BlockSpec((rows, _LANE), lambda: (0, 0)),
                smem, smem, smem, smem,
            ],
            out_specs=pl.BlockSpec((rows, _LANE), lambda: (0, 0)),
        )(x_lane, w1, b1, w2, b2)

    return out_lane.reshape(Np)[:N].reshape(N, 1)


@functools.partial(jax.jit, static_argnames=("block_n",))
def _forward_mxu(x, w1p, b1p, w2p, b2p, *, block_n=1024):
    """General path.  Output is emitted at its logical (N, n_output) shape."""
    N, F = x.shape
    Hp = w1p.shape[1]
    O = b2p.shape[1]

    if N > block_n:
        # Batch-parallel cdiv grid: >= 2 steps, ragged last tile masked.
        out = pl.pallas_call(
            _mlp_kernel_mxu,
            out_shape=jax.ShapeDtypeStruct((N, O), jnp.float32),
            grid=(pl.cdiv(N, block_n),),
            in_specs=[
                pl.BlockSpec((block_n, F), lambda i: (i, 0)),
                pl.BlockSpec(w1p.shape, lambda i: (0, 0)),
                pl.BlockSpec(b1p.shape, lambda i: (0, 0)),
                pl.BlockSpec(w2p.shape, lambda i: (0, 0)),
                pl.BlockSpec(b2p.shape, lambda i: (0, 0)),
            ],
            out_specs=pl.BlockSpec((block_n, O), lambda i: (i, 0)),
            compiler_params=pltpu.CompilerParams(
                dimension_semantics=("parallel",)),
        )(x, w1p, b1p, w2p, b2p)
    else:
        # Gridless single block; block shapes == full array dims.
        out = pl.pallas_call(
            _mlp_kernel_mxu,
            out_shape=jax.ShapeDtypeStruct((N, O), jnp.float32),
            in_specs=[
                pl.BlockSpec((N, F), lambda: (0, 0)),
                pl.BlockSpec(w1p.shape, lambda: (0, 0)),
                pl.BlockSpec(b1p.shape, lambda: (0, 0)),
                pl.BlockSpec(w2p.shape, lambda: (0, 0)),
                pl.BlockSpec(b2p.shape, lambda: (0, 0)),
            ],
            out_specs=pl.BlockSpec((N, O), lambda: (0, 0)),
        )(x, w1p, b1p, w2p, b2p)
    return out


def net_forward(x, prepared, *, block_n=1024, block_rows=64):
    """Forward pass of Net.  `prepared` = prepare_params(w1, b1, w2, b2)."""
    mode, params = prepared
    if mode == "lane":
        return _forward_lane(x, *params, block_rows=block_rows)
    return _forward_mxu(x, *params, block_n=block_n)


# --------------------------------------------------------------------------
# Init (PyTorch-style Linear init) and self-test
# --------------------------------------------------------------------------
def init_params(key, n_features, n_hidden, n_output):
    """U(-1/sqrt(fan_in), 1/sqrt(fan_in)), same as torch.nn.Linear default."""
    k1, k2, k3, k4 = jax.random.split(key, 4)
    bound1 = 1.0 / jnp.sqrt(jnp.float32(n_features))
    bound2 = 1.0 / jnp.sqrt(jnp.float32(n_hidden))
    w1 = jax.random.uniform(k1, (n_features, n_hidden), jnp.float32, -bound1, bound1)
    b1 = jax.random.uniform(k2, (n_hidden,), jnp.float32, -bound1, bound1)
    w2 = jax.random.uniform(k3, (n_hidden, n_output), jnp.float32, -bound2, bound2)
    b2 = jax.random.uniform(k4, (n_output,), jnp.float32, -bound2, bound2)
    return w1, b1, w2, b2


if __name__ == "__main__":
    # Reference shapes from the spec script:
    #   x = unsqueeze(linspace(-1, 1, 100), dim=1) -> (100, 1)
    #   Net(n_features=1, n_hidden=10, n_output=1)
    N, n_features, n_hidden, n_output = 100, 1, 10, 1

    x = jnp.expand_dims(jnp.linspace(-1.0, 1.0, N, dtype=jnp.float32), axis=1)
    w1, b1, w2, b2 = init_params(jax.random.PRNGKey(0), n_features, n_hidden, n_output)

    prepared = prepare_params(w1, b1, w2, b2)      # once, outside per-call path
    y = jax.block_until_ready(net_forward(x, prepared))

    y_ref = jnp.maximum(x @ w1 + b1, 0.0) @ w2 + b2
    assert y.shape == (N, n_output)
    assert jnp.allclose(y, y_ref, atol=1e-5, rtol=1e-5)

    # Also exercise the general MXU path (O>1) and the O==1 row-reduce path
    # at small shapes to keep them honest.
    for (Ng, Fg, Hg, Og) in [(96, 8, 32, 4), (96, 8, 32, 1)]:
        xg = jax.random.normal(jax.random.PRNGKey(1), (Ng, Fg), jnp.float32)
        pg = init_params(jax.random.PRNGKey(2), Fg, Hg, Og)
        yg = jax.block_until_ready(net_forward(xg, prepare_params(*pg)))
        yr = jnp.maximum(xg @ pg[0] + pg[1], 0.0) @ pg[2] + pg[3]
        assert yg.shape == (Ng, Og)
        assert jnp.allclose(yg, yr, atol=1e-3, rtol=1e-3)

    print("KERNEL_OK")
</pallas_src>

<mosaic_0001>
module attributes {stable_mosaic.version = 11 : i64} {
  func.func @_mlp_kernel_lane(%arg0: memref<1x128xf32, #tpu.memory_space<vmem>>, %arg1: memref<10xf32, #tpu.memory_space<smem>>, %arg2: memref<10xf32, #tpu.memory_space<smem>>, %arg3: memref<10xf32, #tpu.memory_space<smem>>, %arg4: memref<1xf32, #tpu.memory_space<smem>>, %arg5: memref<1x128xf32, #tpu.memory_space<vmem>>) attributes {dimension_semantics = [], scalar_prefetch = 0 : i64, scratch_operands = 0 : i64, tpu.core_type = #tpu.core_type<tc>} {
    %c0 = arith.constant 0 : index
    %c0_0 = arith.constant 0 : index
    %0 = vector.load %arg0[%c0, %c0_0] : memref<1x128xf32, #tpu.memory_space<vmem>>, vector<1x128xf32>
    %cst = arith.constant 0.000000e+00 : f32
    %1 = vector.broadcast %cst : f32 to vector<1x128xf32>
    %c0_1 = arith.constant 0 : index
    %2 = memref.load %arg3[%c0_1] : memref<10xf32, #tpu.memory_space<smem>>
    %c0_2 = arith.constant 0 : index
    %3 = memref.load %arg1[%c0_2] : memref<10xf32, #tpu.memory_space<smem>>
    %4 = vector.broadcast %3 : f32 to vector<1x128xf32>
    %5 = arith.mulf %4, %0 : vector<1x128xf32>
    %c0_3 = arith.constant 0 : index
    %6 = memref.load %arg2[%c0_3] : memref<10xf32, #tpu.memory_space<smem>>
    %7 = vector.broadcast %6 : f32 to vector<1x128xf32>
    %8 = arith.addf %5, %7 : vector<1x128xf32>
    %cst_4 = arith.constant 0.000000e+00 : f32
    %9 = vector.broadcast %cst_4 : f32 to vector<1x128xf32>
    %10 = arith.maximumf %8, %9 : vector<1x128xf32>
    %11 = vector.broadcast %2 : f32 to vector<1x128xf32>
    %12 = arith.mulf %11, %10 : vector<1x128xf32>
    %13 = arith.addf %1, %12 : vector<1x128xf32>
    %c1 = arith.constant 1 : index
    %14 = memref.load %arg3[%c1] : memref<10xf32, #tpu.memory_space<smem>>
    %c1_5 = arith.constant 1 : index
    %15 = memref.load %arg1[%c1_5] : memref<10xf32, #tpu.memory_space<smem>>
    %16 = vector.broadcast %15 : f32 to vector<1x128xf32>
    %17 = arith.mulf %16, %0 : vector<1x128xf32>
    %c1_6 = arith.constant 1 : index
    %18 = memref.load %arg2[%c1_6] : memref<10xf32, #tpu.memory_space<smem>>
    %19 = vector.broadcast %18 : f32 to vector<1x128xf32>
    %20 = arith.addf %17, %19 : vector<1x128xf32>
    %cst_7 = arith.constant 0.000000e+00 : f32
    %21 = vector.broadcast %cst_7 : f32 to vector<1x128xf32>
    %22 = arith.maximumf %20, %21 : vector<1x128xf32>
    %23 = vector.broadcast %14 : f32 to vector<1x128xf32>
    %24 = arith.mulf %23, %22 : vector<1x128xf32>
    %25 = arith.addf %13, %24 : vector<1x128xf32>
    %c2 = arith.constant 2 : index
    %26 = memref.load %arg3[%c2] : memref<10xf32, #tpu.memory_space<smem>>
    %c2_8 = arith.constant 2 : index
    %27 = memref.load %arg1[%c2_8] : memref<10xf32, #tpu.memory_space<smem>>
    %28 = vector.broadcast %27 : f32 to vector<1x128xf32>
    %29 = arith.mulf %28, %0 : vector<1x128xf32>
    %c2_9 = arith.constant 2 : index
    %30 = memref.load %arg2[%c2_9] : memref<10xf32, #tpu.memory_space<smem>>
    %31 = vector.broadcast %30 : f32 to vector<1x128xf32>
    %32 = arith.addf %29, %31 : vector<1x128xf32>
    %cst_10 = arith.constant 0.000000e+00 : f32
    %33 = vector.broadcast %cst_10 : f32 to vector<1x128xf32>
    %34 = arith.maximumf %32, %33 : vector<1x128xf32>
    %35 = vector.broadcast %26 : f32 to vector<1x128xf32>
    %36 = arith.mulf %35, %34 : vector<1x128xf32>
    %37 = arith.addf %25, %36 : vector<1x128xf32>
    %c3 = arith.constant 3 : index
    %38 = memref.load %arg3[%c3] : memref<10xf32, #tpu.memory_space<smem>>
    %c3_11 = arith.constant 3 : index
    %39 = memref.load %arg1[%c3_11] : memref<10xf32, #tpu.memory_space<smem>>
    %40 = vector.broadcast %39 : f32 to vector<1x128xf32>
    %41 = arith.mulf %40, %0 : vector<1x128xf32>
    %c3_12 = arith.constant 3 : index
    %42 = memref.load %arg2[%c3_12] : memref<10xf32, #tpu.memory_space<smem>>
    %43 = vector.broadcast %42 : f32 to vector<1x128xf32>
    %44 = arith.addf %41, %43 : vector<1x128xf32>
    %cst_13 = arith.constant 0.000000e+00 : f32
    %45 = vector.broadcast %cst_13 : f32 to vector<1x128xf32>
    %46 = arith.maximumf %44, %45 : vector<1x128xf32>
    %47 = vector.broadcast %38 : f32 to vector<1x128xf32>
    %48 = arith.mulf %47, %46 : vector<1x128xf32>
    %49 = arith.addf %37, %48 : vector<1x128xf32>
    %c4 = arith.constant 4 : index
    %50 = memref.load %arg3[%c4] : memref<10xf32, #tpu.memory_space<smem>>
    %c4_14 = arith.constant 4 : index
    %51 = memref.load %arg1[%c4_14] : memref<10xf32, #tpu.memory_space<smem>>
    %52 = vector.broadcast %51 : f32 to vector<1x128xf32>
    %53 = arith.mulf %52, %0 : vector<1x128xf32>
    %c4_15 = arith.constant 4 : index
    %54 = memref.load %arg2[%c4_15] : memref<10xf32, #tpu.memory_space<smem>>
    %55 = vector.broadcast %54 : f32 to vector<1x128xf32>
    %56 = arith.addf %53, %55 : vector<1x128xf32>
    %cst_16 = arith.constant 0.000000e+00 : f32
    %57 = vector.broadcast %cst_16 : f32 to vector<1x128xf32>
    %58 = arith.maximumf %56, %57 : vector<1x128xf32>
    %59 = vector.broadcast %50 : f32 to vector<1x128xf32>
    %60 = arith.mulf %59, %58 : vector<1x128xf32>
    %61 = arith.addf %49, %60 : vector<1x128xf32>
    %c5 = arith.constant 5 : index
    %62 = memref.load %arg3[%c5] : memref<10xf32, #tpu.memory_space<smem>>
    %c5_17 = arith.constant 5 : index
    %63 = memref.load %arg1[%c5_17] : memref<10xf32, #tpu.memory_space<smem>>
    %64 = vector.broadcast %63 : f32 to vector<1x128xf32>
    %65 = arith.mulf %64, %0 : vector<1x128xf32>
    %c5_18 = arith.constant 5 : index
    %66 = memref.load %arg2[%c5_18] : memref<10xf32, #tpu.memory_space<smem>>
    %67 = vector.broadcast %66 : f32 to vector<1x128xf32>
    %68 = arith.addf %65, %67 : vector<1x128xf32>
    %cst_19 = arith.constant 0.000000e+00 : f32
    %69 = vector.broadcast %cst_19 : f32 to vector<1x128xf32>
    %70 = arith.maximumf %68, %69 : vector<1x128xf32>
    %71 = vector.broadcast %62 : f32 to vector<1x128xf32>
    %72 = arith.mulf %71, %70 : vector<1x128xf32>
    %73 = arith.addf %61, %72 : vector<1x128xf32>
    %c6 = arith.constant 6 : index
    %74 = memref.load %arg3[%c6] : memref<10xf32, #tpu.memory_space<smem>>
    %c6_20 = arith.constant 6 : index
    %75 = memref.load %arg1[%c6_20] : memref<10xf32, #tpu.memory_space<smem>>
    %76 = vector.broadcast %75 : f32 to vector<1x128xf32>
    %77 = arith.mulf %76, %0 : vector<1x128xf32>
    %c6_21 = arith.constant 6 : index
    %78 = memref.load %arg2[%c6_21] : memref<10xf32, #tpu.memory_space<smem>>
    %79 = vector.broadcast %78 : f32 to vector<1x128xf32>
    %80 = arith.addf %77, %79 : vector<1x128xf32>
    %cst_22 = arith.constant 0.000000e+00 : f32
    %81 = vector.broadcast %cst_22 : f32 to vector<1x128xf32>
    %82 = arith.maximumf %80, %81 : vector<1x128xf32>
    %83 = vector.broadcast %74 : f32 to vector<1x128xf32>
    %84 = arith.mulf %83, %82 : vector<1x128xf32>
    %85 = arith.addf %73, %84 : vector<1x128xf32>
    %c7 = arith.constant 7 : index
    %86 = memref.load %arg3[%c7] : memref<10xf32, #tpu.memory_space<smem>>
    %c7_23 = arith.constant 7 : index
    %87 = memref.load %arg1[%c7_23] : memref<10xf32, #tpu.memory_space<smem>>
    %88 = vector.broadcast %87 : f32 to vector<1x128xf32>
    %89 = arith.mulf %88, %0 : vector<1x128xf32>
    %c7_24 = arith.constant 7 : index
    %90 = memref.load %arg2[%c7_24] : memref<10xf32, #tpu.memory_space<smem>>
    %91 = vector.broadcast %90 : f32 to vector<1x128xf32>
    %92 = arith.addf %89, %91 : vector<1x128xf32>
    %cst_25 = arith.constant 0.000000e+00 : f32
    %93 = vector.broadcast %cst_25 : f32 to vector<1x128xf32>
    %94 = arith.maximumf %92, %93 : vector<1x128xf32>
    %95 = vector.broadcast %86 : f32 to vector<1x128xf32>
    %96 = arith.mulf %95, %94 : vector<1x128xf32>
    %97 = arith.addf %85, %96 : vector<1x128xf32>
    %c8 = arith.constant 8 : index
    %98 = memref.load %arg3[%c8] : memref<10xf32, #tpu.memory_space<smem>>
    %c8_26 = arith.constant 8 : index
    %99 = memref.load %arg1[%c8_26] : memref<10xf32, #tpu.memory_space<smem>>
    %100 = vector.broadcast %99 : f32 to vector<1x128xf32>
    %101 = arith.mulf %100, %0 : vector<1x128xf32>
    %c8_27 = arith.constant 8 : index
    %102 = memref.load %arg2[%c8_27] : memref<10xf32, #tpu.memory_space<smem>>
    %103 = vector.broadcast %102 : f32 to vector<1x128xf32>
    %104 = arith.addf %101, %103 : vector<1x128xf32>
    %cst_28 = arith.constant 0.000000e+00 : f32
    %105 = vector.broadcast %cst_28 : f32 to vector<1x128xf32>
    %106 = arith.maximumf %104, %105 : vector<1x128xf32>
    %107 = vector.broadcast %98 : f32 to vector<1x128xf32>
    %108 = arith.mulf %107, %106 : vector<1x128xf32>
    %109 = arith.addf %97, %108 : vector<1x128xf32>
    %c9 = arith.constant 9 : index
    %110 = memref.load %arg3[%c9] : memref<10xf32, #tpu.memory_space<smem>>
    %c9_29 = arith.constant 9 : index
    %111 = memref.load %arg1[%c9_29] : memref<10xf32, #tpu.memory_space<smem>>
    %112 = vector.broadcast %111 : f32 to vector<1x128xf32>
    %113 = arith.mulf %112, %0 : vector<1x128xf32>
    %c9_30 = arith.constant 9 : index
    %114 = memref.load %arg2[%c9_30] : memref<10xf32, #tpu.memory_space<smem>>
    %115 = vector.broadcast %114 : f32 to vector<1x128xf32>
    %116 = arith.addf %113, %115 : vector<1x128xf32>
    %cst_31 = arith.constant 0.000000e+00 : f32
    %117 = vector.broadcast %cst_31 : f32 to vector<1x128xf32>
    %118 = arith.maximumf %116, %117 : vector<1x128xf32>
    %119 = vector.broadcast %110 : f32 to vector<1x128xf32>
    %120 = arith.mulf %119, %118 : vector<1x128xf32>
    %121 = arith.addf %109, %120 : vector<1x128xf32>
    %c0_32 = arith.constant 0 : index
    %122 = memref.load %arg4[%c0_32] : memref<1xf32, #tpu.memory_space<smem>>
    %123 = vector.broadcast %122 : f32 to vector<1x128xf32>
    %124 = arith.addf %121, %123 : vector<1x128xf32>
    %c0_33 = arith.constant 0 : index
    %c0_34 = arith.constant 0 : index
    %125 = vector.load %arg5[%c0_33, %c0_34] : memref<1x128xf32, #tpu.memory_space<vmem>>, vector<1x128xf32>
    tpu.vector_store %arg5[%c0_33, %c0_34], %124 {strides = array<i32>} : memref<1x128xf32, #tpu.memory_space<vmem>>, vector<1x128xf32>,
    return
  }
}

</mosaic_0001>

<bundles_post_ra>
// kernel: _forward_lane.1
= control target key start
LH: loop header
LB: loop body
LE: loop exit
PB: predicated region body
PF: predicated region fallthrough
CT: control target
= control target key end

     0   :  { %11 = vsyncpa [#allocation4], 0  ;;  %s329_s0 = inlined_call_operand.vmem [shape: f32[1,128], index: 0, kind: input, shape index: {}]   ;;  %s330_s1 = inlined_call_operand.vmem [shape: f32[10], index: 1, kind: input, shape index: {}]   ;;  %s331_s2 = inlined_call_operand.vmem [shape: f32[10], index: 2, kind: input, shape index: {}]   ;;  %s332_s3 = inlined_call_operand.vmem [shape: f32[10], index: 3, kind: input, shape index: {}]   ;;  %s333_s4 = inlined_call_operand.<no memory space> [shape: f32[1], index: 4, kind: input, shape index: {}]   ;;  %s334_s5 = inlined_call_operand.vmem [shape: f32[1,128], index: 5, kind: output, shape index: {}]  }
   0x1   :  { %12 = vsyncpa [#allocation6], 0  ;;  %s31_s20 = sshll.u32 %s331_s2, 4  ;;  %s21_s23 = sshll.u32 %s330_s1, 4  ;;  %s32_s20 = int_to_ptr.vmem [resolvable:$true] %s31_s20  ;;  %s22_s23 = int_to_ptr.vmem [resolvable:$true] %s21_s23 }
   0x2   :  { %s208_s24 = scalar_lea.vmem %s32_s20, 16  ;;  %p213_p1 = scmp.lt.s32.totalorder %s32_s20, %s32_s20 }
   0x3   :  { %p209_p0 = scmp.ne.s32.totalorder %s32_s20, %s208_s24  ;;  %p214_p2 = scmp.lt.s32.totalorder %s208_s24, %s208_s24 }
   0x5   :  { %p215_p3 = por %p214_p2, %p213_p1 }
   0x7   :  { %p216_p4 = pnand %p215_p3, %p209_p0 }
   0x9   :  { %219 = shalt.err (!%p216_p4)
}
   0xa   :  { %s248_s25 = smov [#allocation5]   ;;  %s220_s26 = scalar_lea.vmem %s22_s23, 16 }
   0xb   :  { %34 = dma.vmem_to_smem %s32_s20, 16, %s248_s25, [#allocation6]  }
   0xc   :  { %p221_p5 = scmp.ne.s32.totalorder %s22_s23, %s220_s26  ;;  %p225_p6 = scmp.lt.s32.totalorder %s22_s23, %s22_s23 }
   0xd   :  { %p226_p7 = scmp.lt.s32.totalorder %s220_s26, %s220_s26 }
   0xf   :  { %p227_p8 = por %p226_p7, %p225_p6 }
  0x11   :  { %p228_p9 = pnand %p227_p8, %p221_p5 }
  0x13   :  { %231 = shalt.err (!%p228_p9)
}
  0x14   :  { %s249_s2 = smov [#allocation3]   ;;  %s41_s28 = sshll.u32 %s332_s3, 4  ;;  %s42_s28 = int_to_ptr.vmem [resolvable:$true] %s41_s28 }
  0x15   :  { %24 = dma.vmem_to_smem %s22_s23, 16, %s249_s2, [#allocation4]  }
  0x16   :  { %s232_s29 = scalar_lea.vmem %s42_s28, 16  ;;  %p237_p11 = scmp.lt.s32.totalorder %s42_s28, %s42_s28 }
  0x17   :  { %p233_p10 = scmp.ne.s32.totalorder %s42_s28, %s232_s29  ;;  %p238_p12 = scmp.lt.s32.totalorder %s232_s29, %s232_s29 }
  0x19   :  { %p239_p13 = por %p238_p12, %p237_p11 }
  0x1b   :  { %p240_p0 = pnand %p239_p13, %p233_p10 }
  0x1d   :  { %243 = shalt.err (!%p240_p0)
}
  0x1e   :  { %s250_s30 = smov [#allocation7]  }
  0x1f   :  { %44 = dma.vmem_to_smem %s42_s28, 16, %s250_s30, [#allocation6]  }
  0x20   :  { %244 = dma.done.wait [#allocation4], 16  }
  0x21   :  { %245 = vsyncadd [#allocation4], 4294967280 }
  0x22   :  { %246 = dma.done.wait [#allocation6], 32  }
  0x23   :  { %247 = vsyncadd [#allocation6], 4294967264 }
  0x24   :  { %56 = sfence }
  0x25   :  { %s59_s6 = sld [smem:[#allocation3]]  ;;  %v293_v0 = vld [vmem:[%s329_s0] sm:$0x1] }
  0x26   :  { %s62_s7 = sld [smem:[#allocation5]] }
  0x27   :  { %s58_s8 = sld [smem:[#allocation7]] }
  0x28   :  { %s179_s9 = sld [smem:[#allocation3 + $0x1]] }
  0x29   :  { %s180_s11 = sld [smem:[#allocation5 + $0x1]] }
  0x2a   :  { %s178_s12 = sld [smem:[#allocation7 + $0x1]] }
  0x2b   :  { %v60_v1 = vstv %s59_s6  ;;  %s182_s13 = sld [smem:[#allocation3 + $0x2]] }
  0x2c   :  { %v61_v2 = vmul.f32 %v60_v1, %v293_v0  ;;  %v63_v3 = vstv %s62_s7  ;;  %s183_s14 = sld [smem:[#allocation5 + $0x2]] }
  0x2d   :  { %s296_s15 = sld [smem:[#allocation7 + $0x2]]  ;;  %v66_v9 = vstv %s58_s8 }
  0x2e   :  { %v64_v4 = vadd.f32 %v63_v3, %v61_v2  ;;  %v71_v5 = vstv %s179_s9  ;;  %s185_s16 = sld [smem:[#allocation3 + $0x3]] }
  0x2f   :  { %v72_v6 = vmul.f32 %v71_v5, %v293_v0  ;;  %v74_v7 = vstv %s180_s11  ;;  %s186_s17 = sld [smem:[#allocation5 + $0x3]] }
  0x30   :  { %v65_v8 = vmax.f32 %v64_v4, 0.0  ;;  %s299_s0 = sld [smem:[#allocation7 + $0x3]]  ;;  %v77_v12 = vstv %s178_s12 }
  0x31   :  { %v75_v10 = vadd.f32 %v74_v7, %v72_v6  ;;  %v82_v11 = vstv %s182_s13  ;;  %s188_s18 = sld [smem:[#allocation3 + $0x4]] }
  0x32   :  { %v83_v13 = vmul.f32 %v82_v11, %v293_v0  ;;  %v85_v14 = vstv %s183_s14  ;;  %s189_s19 = sld [smem:[#allocation5 + $0x4]]  ;;  %v67_v15 = vmul.f32 %v66_v9, %v65_v8 }
  0x33   :  { %v76_v16 = vmax.f32 %v75_v10, 0.0  ;;  %s302_s20 = sld [smem:[#allocation7 + $0x4]]  ;;  %v88_v20 = vstv %s296_s15 }
  0x34   :  { %v86_v17 = vadd.f32 %v85_v14, %v83_v13  ;;  %v93_v18 = vstv %s185_s16  ;;  %s191_s21 = sld [smem:[#allocation3 + $0x5]] }
  0x35   :  { %v78_v19 = vmul.f32 %v77_v12, %v76_v16  ;;  %v94_v21 = vmul.f32 %v93_v18, %v293_v0  ;;  %v96_v22 = vstv %s186_s17  ;;  %s192_s22 = sld [smem:[#allocation5 + $0x5]]  ;;  %v169_v16 = vstv %s333_s4 }
  0x36   :  { %v87_v23 = vmax.f32 %v86_v17, 0.0  ;;  %s306_s23 = sld [smem:[#allocation7 + $0x5]]  ;;  %v99_v28 = vstv %s299_s0 }
  0x37   :  { %v79_v24 = vadd.f32 %v78_v19, %v67_v15  ;;  %v97_v25 = vadd.f32 %v96_v22, %v94_v21  ;;  %v104_v26 = vstv %s188_s18  ;;  %s194_s24 = sld [smem:[#allocation3 + $0x6]] }
  0x38   :  { %v89_v27 = vmul.f32 %v88_v20, %v87_v23  ;;  %v105_v29 = vmul.f32 %v104_v26, %v293_v0  ;;  %v107_v30 = vstv %s189_s19  ;;  %s195_s25 = sld [smem:[#allocation5 + $0x6]] }
  0x39   :  { %v98_v31 = vmax.f32 %v97_v25, 0.0  ;;  %s310_s26 = sld [smem:[#allocation7 + $0x6]]  ;;  %v110_v36 = vstv %s302_s20 }
  0x3a   :  { %v90_v32 = vadd.f32 %v89_v27, %v79_v24  ;;  %v108_v33 = vadd.f32 %v107_v30, %v105_v29  ;;  %v115_v34 = vstv %s191_s21  ;;  %s197_s2 = sld [smem:[#allocation3 + $0x7]] }
  0x3b   :  { %v100_v35 = vmul.f32 %v99_v28, %v98_v31  ;;  %v116_v37 = vmul.f32 %v115_v34, %v293_v0  ;;  %v118_v38 = vstv %s192_s22  ;;  %s198_s1 = sld [smem:[#allocation5 + $0x7]] }
  0x3c   :  { %v109_v39 = vmax.f32 %v108_v33, 0.0  ;;  %s314_s27 = sld [smem:[#allocation7 + $0x7]]  ;;  %v121_v44 = vstv %s306_s23 }
  0x3d   :  { %v101_v40 = vadd.f32 %v100_v35, %v90_v32  ;;  %v119_v41 = vadd.f32 %v118_v38, %v116_v37  ;;  %v126_v42 = vstv %s194_s24  ;;  %s200_s28 = sld [smem:[#allocation3 + $0x8]] }
  0x3e   :  { %v111_v43 = vmul.f32 %v110_v36, %v109_v39  ;;  %v127_v45 = vmul.f32 %v126_v42, %v293_v0  ;;  %v129_v46 = vstv %s195_s25  ;;  %s201_s29 = sld [smem:[#allocation5 + $0x8]] }
  0x3f   :  { %v120_v47 = vmax.f32 %v119_v41, 0.0  ;;  %s199_s30 = sld [smem:[#allocation7 + $0x8]]  ;;  %v132_v52 = vstv %s310_s26 }
  0x40   :  { %v112_v48 = vadd.f32 %v111_v43, %v101_v40  ;;  %v130_v49 = vadd.f32 %v129_v46, %v127_v45  ;;  %v137_v50 = vstv %s197_s2  ;;  %s203_s6 = sld [smem:[#allocation3 + $0x9]] }
  0x41   :  { %v122_v51 = vmul.f32 %v121_v44, %v120_v47  ;;  %v138_v53 = vmul.f32 %v137_v50, %v293_v0  ;;  %v140_v54 = vstv %s198_s1  ;;  %s204_s7 = sld [smem:[#allocation5 + $0x9]] }
  0x42   :  { %v131_v55 = vmax.f32 %v130_v49, 0.0  ;;  %s202_s8 = sld [smem:[#allocation7 + $0x9]]  ;;  %v143_v60 = vstv %s314_s27 }
  0x43   :  { %v123_v56 = vadd.f32 %v122_v51, %v112_v48  ;;  %v141_v57 = vadd.f32 %v140_v54, %v138_v53  ;;  %v148_v58 = vstv %s200_s28 }
  0x44   :  { %v133_v59 = vmul.f32 %v132_v52, %v131_v55  ;;  %v149_v61 = vmul.f32 %v148_v58, %v293_v0  ;;  %v151_v62 = vstv %s201_s29 }
  0x45   :  { %v142_v63 = vmax.f32 %v141_v57, 0.0  ;;  %v154_v5 = vstv %s199_s30 }
  0x46   :  { %v134_v1 = vadd.f32 %v133_v59, %v123_v56  ;;  %v152_v2 = vadd.f32 %v151_v62, %v149_v61  ;;  %v159_v3 = vstv %s203_s6 }
  0x47   :  { %v144_v4 = vmul.f32 %v143_v60, %v142_v63  ;;  %v160_v6 = vmul.f32 %v159_v3, %v293_v0  ;;  %v162_v7 = vstv %s204_s7 }
  0x48   :  { %v153_v8 = vmax.f32 %v152_v2, 0.0  ;;  %v165_v12 = vstv %s202_s8 }
  0x49   :  { %v145_v9 = vadd.f32 %v144_v4, %v134_v1  ;;  %v163_v10 = vadd.f32 %v162_v7, %v160_v6 }
  0x4a   :  { %v155_v11 = vmul.f32 %v154_v5, %v153_v8 }
  0x4b   :  { %v164_v13 = vmax.f32 %v163_v10, 0.0 }
  0x4c   :  { %v156_v14 = vadd.f32 %v155_v11, %v145_v9 }
  0x4d   :  { %v166_v15 = vmul.f32 %v165_v12, %v164_v13 }
  0x4f   :  { %v167_v17 = vadd.f32 %v166_v15, %v156_v14 }
  0x51   :  { %v170_v18 = vadd.f32 %v169_v16, %v167_v17 }
  0x53   :  { %171 = vst [vmem:[%s334_s5] sm:$0x1] %v170_v18 }
  0x54   :  { %176 = vsyncpa [#allocation4], 1 }
  0x55   :  { %177 = vsyncpa [#allocation6], 1 }

</bundles_post_ra>
